<compile_context>
chip_gen: v6e
topology: v6e:2x2x1
jax: 0.10.0
libtpu: 0.0.40
codegen_flags: <defaults>
</compile_context>

<pallas_src>
import math
import numpy as np
import jax
import jax.numpy as jnp
from jax import lax
from jax.experimental import pallas as pl
from jax.experimental.pallas import tpu as pltpu  # noqa: F401  (imported per template)

# Small, module-consistent shapes (d_model divisible by the number of heads).
B, S, D, H, DFF = 2, 8, 32, 4, 64
DK = D // H
BS = B * S
HBS = H * BS
EPS = 1e-6
NEG = -1e9

# ---------- packed parameter slab layout ([P_ROWS, 128] f32, built once) ----------
R_WQKV = 0                 # [D, 3D]   fused Wq|Wk|Wv
R_WO = R_WQKV + D          # [D, D]
R_W1 = R_WO + D            # [D, DFF]
R_W2 = R_W1 + D            # [DFF, D]
R_HEAD = R_W2 + DFF        # [HBS, D]  head-selection mask (constant)
R_SAMEB = R_HEAD + HBS     # [HBS, BS] same-batch mask (constant)
R_A1 = R_SAMEB + HBS       # [1, D]
R_B1 = R_A1 + 1            # [1, D]
R_A2 = R_B1 + 1            # [1, D]
R_B2 = R_A2 + 1            # [1, D]
R_BQKV = R_B2 + 1          # [1, 3D]
R_BO = R_BQKV + 1          # [1, D]
R_B1F = R_BO + 1           # [1, DFF]
R_B2F = R_B1F + 1          # [1, D]
P_ROWS = R_B2F + 1         # 296  (multiple of 8)
P_LANES = 128


def _layer_norm(x, a, b):
    # Matches the PyTorch module: unbiased (N-1) std, eps added to the std, exact divide.
    mean = jnp.mean(x, axis=-1, keepdims=True)
    var = jnp.sum((x - mean) ** 2, axis=-1, keepdims=True) / (x.shape[-1] - 1)
    return a * (x - mean) / (jnp.sqrt(var) + EPS) + b


def encoder_layer_kernel(x_ref, keep_ref, p_ref, o_ref):
    x = x_ref[...]                                   # [BS, D]   (batch folded into rows)
    keep = keep_ref[...] > 0.0                       # [1, BS]   key-keep mask

    # ---- static sub-views of the packed parameter slab (cheap ref slices) ----
    wqkv = p_ref[R_WQKV:R_WQKV + D, 0:3 * D]         # [D, 3D]
    wo = p_ref[R_WO:R_WO + D, 0:D]                   # [D, D]
    w1 = p_ref[R_W1:R_W1 + D, 0:DFF]                 # [D, DFF]
    w2 = p_ref[R_W2:R_W2 + DFF, 0:D]                 # [DFF, D]
    hmask = p_ref[R_HEAD:R_HEAD + HBS, 0:D]          # [HBS, D]  1 where lane belongs to row-block's head
    sameb = p_ref[R_SAMEB:R_SAMEB + HBS, 0:BS] > 0.0  # [HBS, BS]
    a1 = p_ref[R_A1:R_A1 + 1, 0:D]
    b1 = p_ref[R_B1:R_B1 + 1, 0:D]
    a2 = p_ref[R_A2:R_A2 + 1, 0:D]
    b2 = p_ref[R_B2:R_B2 + 1, 0:D]
    bqkv = p_ref[R_BQKV:R_BQKV + 1, 0:3 * D]
    bo = p_ref[R_BO:R_BO + 1, 0:D]
    b1f = p_ref[R_B1F:R_B1F + 1, 0:DFF]
    b2f = p_ref[R_B2F:R_B2F + 1, 0:D]

    # ---- sublayer 0: pre-LN multi-head self-attention + residual ----
    ln1 = _layer_norm(x, a1, b1)
    qkv = jnp.dot(ln1, wqkv, preferred_element_type=jnp.float32) + bqkv     # [BS, 3D]
    q = qkv[:, 0 * D:1 * D]
    k = qkv[:, 1 * D:2 * D]
    v = qkv[:, 2 * D:3 * D]

    # Fold heads into rows: q replicated per head, masked to that head's lanes.
    qm = jnp.concatenate([q] * H, axis=0) * hmask                           # [HBS, D]
    # Scores for ALL heads in one matmul; contract last dims (no materialized k^T).
    s = lax.dot_general(qm, k, (((1,), (1,)), ((), ())),
                        preferred_element_type=jnp.float32) * (1.0 / math.sqrt(DK))  # [HBS, BS]
    # Cross-batch keys / masked keys -> -1e9 (set, as in the reference module).
    s = jnp.where(sameb & keep, s, NEG)

    m = jnp.max(s, axis=-1, keepdims=True)
    e = jnp.exp(s - m)
    p = e / jnp.sum(e, axis=-1, keepdims=True)                              # exact divide
    ctx = jnp.dot(p, v, preferred_element_type=jnp.float32)                 # [HBS, D]

    # Gather the (head-row-block, head-lane-block) diagonal back to [BS, D].
    attn = ctx[0:BS, :] * hmask[0:1, :]
    for h in range(1, H):
        attn = attn + ctx[h * BS:(h + 1) * BS, :] * hmask[h * BS:h * BS + 1, :]

    attn_out = jnp.dot(attn, wo, preferred_element_type=jnp.float32) + bo
    x1 = x + attn_out                                # residual (dropout = identity in eval)

    # ---- sublayer 1: pre-LN position-wise feed-forward + residual ----
    ln2 = _layer_norm(x1, a2, b2)
    hdn = jnp.maximum(jnp.dot(ln2, w1, preferred_element_type=jnp.float32) + b1f, 0.0)
    ff = jnp.dot(hdn, w2, preferred_element_type=jnp.float32) + b2f
    o_ref[...] = x1 + ff


def encoder_layer1(x, mask, packed_params):
    """x: [B, S, D] f32, mask: [B, S] f32 (1 keep / 0 mask), packed_params: [P_ROWS, 128] f32."""
    x2 = x.reshape(BS, D)          # contiguous reshape (metadata only)
    keep = mask.reshape(1, BS)     # contiguous reshape
    full = lambda shp: pl.BlockSpec(shp, lambda: (0,) * len(shp))
    out = pl.pallas_call(
        encoder_layer_kernel,
        out_shape=jax.ShapeDtypeStruct((BS, D), jnp.float32),
        in_specs=[full((BS, D)), full((1, BS)), full((P_ROWS, P_LANES))],
        out_specs=full((BS, D)),
    )(x2, keep, packed_params)
    return out.reshape(B, S, D)


def pack_params(params):
    """One-time packing of all parameters + constant structural masks into a single slab."""
    (a1, b1, wq, bq, wk, bk, wv, bv, wo, bo, a2, b2, w1, b1f, w2, b2f) = [np.asarray(p) for p in params]
    slab = np.zeros((P_ROWS, P_LANES), np.float32)
    slab[R_WQKV:R_WQKV + D, 0:3 * D] = np.concatenate([wq, wk, wv], axis=1)
    slab[R_WO:R_WO + D, 0:D] = wo
    slab[R_W1:R_W1 + D, 0:DFF] = w1
    slab[R_W2:R_W2 + DFF, 0:D] = w2
    # constant structural masks
    slab[R_HEAD:R_HEAD + HBS, 0:D] = np.kron(np.eye(H, dtype=np.float32),
                                             np.ones((BS, DK), np.float32))
    slab[R_SAMEB:R_SAMEB + HBS, 0:BS] = np.tile(
        np.kron(np.eye(B, dtype=np.float32), np.ones((S, S), np.float32)), (H, 1))
    slab[R_A1, 0:D] = a1[0]
    slab[R_B1, 0:D] = b1[0]
    slab[R_A2, 0:D] = a2[0]
    slab[R_B2, 0:D] = b2[0]
    slab[R_BQKV, 0:3 * D] = np.concatenate([bq, bk, bv], axis=1)[0]
    slab[R_BO, 0:D] = bo[0]
    slab[R_B1F, 0:DFF] = b1f[0]
    slab[R_B2F, 0:D] = b2f[0]
    return jnp.asarray(slab)


def reference(x, mask, params):
    (a1, b1, wq, bq, wk, bk, wv, bv, wo, bo, a2, b2, w1, b1f, w2, b2f) = params

    def ln(t, a, b):
        mean = t.mean(-1, keepdims=True)
        std = jnp.sqrt(((t - mean) ** 2).sum(-1, keepdims=True) / (t.shape[-1] - 1))
        return a * (t - mean) / (std + EPS) + b

    # high-precision f32 matmuls so the reference itself is not the low-precision side
    with jax.default_matmul_precision("float32"):
        l1 = ln(x, a1, b1)
        q = l1 @ wq + bq
        k = l1 @ wk + bk
        v = l1 @ wv + bv
        qh = q.reshape(B, S, H, DK).transpose(0, 2, 1, 3)
        kh = k.reshape(B, S, H, DK).transpose(0, 2, 1, 3)
        vh = v.reshape(B, S, H, DK).transpose(0, 2, 1, 3)
        s = jnp.einsum("bhqd,bhkd->bhqk", qh, kh) / math.sqrt(DK)
        s = jnp.where((mask == 0)[:, None, None, :], NEG, s)
        p = jax.nn.softmax(s, axis=-1)
        att = jnp.einsum("bhqk,bhkd->bhqd", p, vh).transpose(0, 2, 1, 3).reshape(B, S, D)
        x1 = x + (att @ wo + bo)
        l2 = ln(x1, a2, b2)
        ff = jnp.maximum(l2 @ w1 + b1f, 0.0) @ w2 + b2f
        return x1 + ff


def make_params(key):
    ks = jax.random.split(key, 8)

    def xavier(k, fan_in, fan_out):
        lim = math.sqrt(6.0 / (fan_in + fan_out))
        return jax.random.uniform(k, (fan_in, fan_out), jnp.float32, -lim, lim)

    a1 = jnp.ones((1, D), jnp.float32)
    b1 = jnp.zeros((1, D), jnp.float32)
    a2 = jnp.ones((1, D), jnp.float32)
    b2 = jnp.zeros((1, D), jnp.float32)
    wq, wk, wv, wo = (xavier(ks[i], D, D) for i in range(4))
    bq = bk = bv = bo = jnp.zeros((1, D), jnp.float32)
    w1 = xavier(ks[4], D, DFF)
    b1f = jnp.zeros((1, DFF), jnp.float32)
    w2 = xavier(ks[5], DFF, D)
    b2f = jnp.zeros((1, D), jnp.float32)
    return (a1, b1, wq, bq, wk, bk, wv, bv, wo, bo, a2, b2, w1, b1f, w2, b2f)


if __name__ == "__main__":
    key = jax.random.PRNGKey(0)
    kx, kp = jax.random.split(key)
    x = jax.random.normal(kx, (B, S, D), jnp.float32)
    # key mask: last two positions of batch element 1 masked out
    mask = jnp.ones((B, S), jnp.float32).at[1, -2:].set(0.0)
    params = make_params(kp)
    packed = pack_params(params)   # one-time packing, outside the per-call hot path

    out = jax.block_until_ready(encoder_layer1(x, mask, packed))
    ref = jax.block_until_ready(reference(x, mask, params))

    assert out.shape == (B, S, D)
    assert bool(jnp.all(jnp.isfinite(out)))
    # Tolerance leaves headroom for TPU matmul-precision differences; a genuine
    # semantic bug (wrong head layout / mask / residual) would be orders larger.
    assert bool(jnp.allclose(out, ref, rtol=1e-2, atol=1e-2)), "mismatch vs reference"
    print("KERNEL_OK")
</pallas_src>

<mosaic_0001>
module attributes {stable_mosaic.version = 11 : i64} {
  func.func @encoder_layer_kernel(%arg0: memref<16x32xf32, #tpu.memory_space<vmem>>, %arg1: memref<1x16xf32, #tpu.memory_space<vmem>>, %arg2: memref<296x128xf32, #tpu.memory_space<vmem>>, %arg3: memref<16x32xf32, #tpu.memory_space<vmem>>) attributes {dimension_semantics = [], scalar_prefetch = 0 : i64, scratch_operands = 0 : i64, tpu.core_type = #tpu.core_type<tc>} {
    %c0 = arith.constant 0 : index
    %c0_0 = arith.constant 0 : index
    %0 = vector.load %arg0[%c0, %c0_0] : memref<16x32xf32, #tpu.memory_space<vmem>>, vector<16x32xf32>
    %c0_1 = arith.constant 0 : index
    %c0_2 = arith.constant 0 : index
    %1 = vector.load %arg1[%c0_1, %c0_2] : memref<1x16xf32, #tpu.memory_space<vmem>>, vector<1x16xf32>
    %cst = arith.constant 0.000000e+00 : f32
    %2 = vector.broadcast %cst : f32 to vector<1x16xf32>
    %3 = arith.cmpf ogt, %1, %2 : vector<1x16xf32>
    %c0_3 = arith.constant 0 : index
    %c0_4 = arith.constant 0 : index
    %4 = vector.load %arg2[%c0_3, %c0_4] : memref<296x128xf32, #tpu.memory_space<vmem>>, vector<32x96xf32>
    %c32 = arith.constant 32 : index
    %c0_5 = arith.constant 0 : index
    %5 = vector.load %arg2[%c32, %c0_5] : memref<296x128xf32, #tpu.memory_space<vmem>>, vector<32x32xf32>
    %c64 = arith.constant 64 : index
    %c0_6 = arith.constant 0 : index
    %6 = vector.load %arg2[%c64, %c0_6] : memref<296x128xf32, #tpu.memory_space<vmem>>, vector<32x64xf32>
    %c96 = arith.constant 96 : index
    %c0_7 = arith.constant 0 : index
    %7 = vector.load %arg2[%c96, %c0_7] : memref<296x128xf32, #tpu.memory_space<vmem>>, vector<64x32xf32>
    %c160 = arith.constant 160 : index
    %c0_8 = arith.constant 0 : index
    %8 = vector.load %arg2[%c160, %c0_8] : memref<296x128xf32, #tpu.memory_space<vmem>>, vector<64x32xf32>
    %c224 = arith.constant 224 : index
    %c0_9 = arith.constant 0 : index
    %9 = vector.load %arg2[%c224, %c0_9] : memref<296x128xf32, #tpu.memory_space<vmem>>, vector<64x16xf32>
    %cst_10 = arith.constant 0.000000e+00 : f32
    %10 = vector.broadcast %cst_10 : f32 to vector<64x16xf32>
    %11 = arith.cmpf ogt, %9, %10 : vector<64x16xf32>
    %c288 = arith.constant 288 : index
    %c0_11 = arith.constant 0 : index
    %12 = vector.load %arg2[%c288, %c0_11] : memref<296x128xf32, #tpu.memory_space<vmem>>, vector<1x32xf32>
    %c289 = arith.constant 289 : index
    %c0_12 = arith.constant 0 : index
    %13 = vector.load %arg2[%c289, %c0_12] : memref<296x128xf32, #tpu.memory_space<vmem>>, vector<1x32xf32>
    %c290 = arith.constant 290 : index
    %c0_13 = arith.constant 0 : index
    %14 = vector.load %arg2[%c290, %c0_13] : memref<296x128xf32, #tpu.memory_space<vmem>>, vector<1x32xf32>
    %c291 = arith.constant 291 : index
    %c0_14 = arith.constant 0 : index
    %15 = vector.load %arg2[%c291, %c0_14] : memref<296x128xf32, #tpu.memory_space<vmem>>, vector<1x32xf32>
    %c292 = arith.constant 292 : index
    %c0_15 = arith.constant 0 : index
    %16 = vector.load %arg2[%c292, %c0_15] : memref<296x128xf32, #tpu.memory_space<vmem>>, vector<1x96xf32>
    %c293 = arith.constant 293 : index
    %c0_16 = arith.constant 0 : index
    %17 = vector.load %arg2[%c293, %c0_16] : memref<296x128xf32, #tpu.memory_space<vmem>>, vector<1x32xf32>
    %c294 = arith.constant 294 : index
    %c0_17 = arith.constant 0 : index
    %18 = vector.load %arg2[%c294, %c0_17] : memref<296x128xf32, #tpu.memory_space<vmem>>, vector<1x64xf32>
    %c295 = arith.constant 295 : index
    %c0_18 = arith.constant 0 : index
    %19 = vector.load %arg2[%c295, %c0_18] : memref<296x128xf32, #tpu.memory_space<vmem>>, vector<1x32xf32>
    %cst_19 = arith.constant dense<0.000000e+00> : vector<16xf32>
    %20 = vector.multi_reduction <add>, %0, %cst_19 [1] : vector<16x32xf32> to vector<16xf32>
    %21 = vector.shape_cast %20 : vector<16xf32> to vector<16x1xf32>
    %cst_20 = arith.constant 3.200000e+01 : f32
    %22 = vector.broadcast %cst_20 : f32 to vector<16x1xf32>
    %23 = arith.divf %21, %22 : vector<16x1xf32>
    %24 = vector.broadcast %23 : vector<16x1xf32> to vector<16x32xf32>
    %25 = arith.subf %0, %24 : vector<16x32xf32>
    %26 = arith.mulf %25, %25 : vector<16x32xf32>
    %cst_21 = arith.constant dense<0.000000e+00> : vector<16xf32>
    %27 = vector.multi_reduction <add>, %26, %cst_21 [1] : vector<16x32xf32> to vector<16xf32>
    %28 = vector.shape_cast %27 : vector<16xf32> to vector<16x1xf32>
    %cst_22 = arith.constant 3.100000e+01 : f32
    %29 = vector.broadcast %cst_22 : f32 to vector<16x1xf32>
    %30 = arith.divf %28, %29 : vector<16x1xf32>
    %31 = vector.broadcast %23 : vector<16x1xf32> to vector<16x32xf32>
    %32 = arith.subf %0, %31 : vector<16x32xf32>
    %33 = vector.broadcast %12 : vector<1x32xf32> to vector<16x32xf32>
    %34 = arith.mulf %33, %32 : vector<16x32xf32>
    %35 = math.sqrt %30 : vector<16x1xf32>
    %cst_23 = arith.constant 9.99999997E-7 : f32
    %36 = vector.broadcast %cst_23 : f32 to vector<16x1xf32>
    %37 = arith.addf %35, %36 : vector<16x1xf32>
    %38 = vector.broadcast %37 : vector<16x1xf32> to vector<16x32xf32>
    %39 = arith.divf %34, %38 : vector<16x32xf32>
    %40 = vector.broadcast %13 : vector<1x32xf32> to vector<16x32xf32>
    %41 = arith.addf %39, %40 : vector<16x32xf32>
    %cst_24 = arith.constant dense<0.000000e+00> : vector<16x96xf32>
    %42 = tpu.matmul %41, %4, %cst_24 {dimension_numbers = #tpu.dot_dimension_numbers<[1], [0], [0], [1], [0, 0, 1, 1], [], []>} : vector<16x32xf32>, vector<32x96xf32>, vector<16x96xf32> -> vector<16x96xf32>
    %43 = vector.broadcast %16 : vector<1x96xf32> to vector<16x96xf32>
    %44 = arith.addf %42, %43 : vector<16x96xf32>
    %45 = vector.extract_strided_slice %44 {offsets = [0, 0], sizes = [16, 32], strides = [1, 1]} : vector<16x96xf32> to vector<16x32xf32>
    %46 = vector.extract_strided_slice %44 {offsets = [0, 32], sizes = [16, 32], strides = [1, 1]} : vector<16x96xf32> to vector<16x32xf32>
    %47 = vector.extract_strided_slice %44 {offsets = [0, 64], sizes = [16, 32], strides = [1, 1]} : vector<16x96xf32> to vector<16x32xf32>
    %48 = tpu.concatenate %45, %45, %45, %45 in 0 : vector<16x32xf32>, vector<16x32xf32>, vector<16x32xf32>, vector<16x32xf32> -> vector<64x32xf32>
    %49 = arith.mulf %48, %8 : vector<64x32xf32>
    %cst_25 = arith.constant dense<0.000000e+00> : vector<64x16xf32>
    %50 = tpu.matmul %49, %46, %cst_25 {dimension_numbers = #tpu.dot_dimension_numbers<[1], [1], [0], [0], [0, 0, 1, 0], [], []>} : vector<64x32xf32>, vector<16x32xf32>, vector<64x16xf32> -> vector<64x16xf32>
    %cst_26 = arith.constant 0.353553385 : f32
    %51 = vector.broadcast %cst_26 : f32 to vector<64x16xf32>
    %52 = arith.mulf %50, %51 : vector<64x16xf32>
    %53 = vector.broadcast %3 : vector<1x16xi1> to vector<64x16xi1>
    %54 = arith.andi %11, %53 : vector<64x16xi1>
    %cst_27 = arith.constant -1.000000e+09 : f32
    %55 = vector.broadcast %cst_27 : f32 to vector<64x16xf32>
    %56 = arith.select %54, %52, %55 : vector<64x16xi1>, vector<64x16xf32>
    %cst_28 = arith.constant dense<0xFF800000> : vector<64xf32>
    %57 = vector.multi_reduction <maximumf>, %56, %cst_28 [1] : vector<64x16xf32> to vector<64xf32>
    %58 = vector.shape_cast %57 : vector<64xf32> to vector<64x1xf32>
    %59 = vector.broadcast %58 : vector<64x1xf32> to vector<64x16xf32>
    %60 = arith.subf %56, %59 : vector<64x16xf32>
    %61 = math.exp %60 : vector<64x16xf32>
    %cst_29 = arith.constant dense<0.000000e+00> : vector<64xf32>
    %62 = vector.multi_reduction <add>, %61, %cst_29 [1] : vector<64x16xf32> to vector<64xf32>
    %63 = vector.shape_cast %62 : vector<64xf32> to vector<64x1xf32>
    %64 = vector.broadcast %63 : vector<64x1xf32> to vector<64x16xf32>
    %65 = arith.divf %61, %64 : vector<64x16xf32>
    %cst_30 = arith.constant dense<0.000000e+00> : vector<64x32xf32>
    %66 = tpu.matmul %65, %47, %cst_30 {dimension_numbers = #tpu.dot_dimension_numbers<[1], [0], [0], [1], [0, 0, 1, 1], [], []>} : vector<64x16xf32>, vector<16x32xf32>, vector<64x32xf32> -> vector<64x32xf32>
    %67 = vector.extract_strided_slice %66 {offsets = [0, 0], sizes = [16, 32], strides = [1, 1]} : vector<64x32xf32> to vector<16x32xf32>
    %68 = vector.extract_strided_slice %8 {offsets = [0, 0], sizes = [1, 32], strides = [1, 1]} : vector<64x32xf32> to vector<1x32xf32>
    %69 = vector.broadcast %68 : vector<1x32xf32> to vector<16x32xf32>
    %70 = arith.mulf %67, %69 : vector<16x32xf32>
    %71 = vector.extract_strided_slice %66 {offsets = [16, 0], sizes = [16, 32], strides = [1, 1]} : vector<64x32xf32> to vector<16x32xf32>
    %72 = vector.extract_strided_slice %8 {offsets = [16, 0], sizes = [1, 32], strides = [1, 1]} : vector<64x32xf32> to vector<1x32xf32>
    %73 = vector.broadcast %72 : vector<1x32xf32> to vector<16x32xf32>
    %74 = arith.mulf %71, %73 : vector<16x32xf32>
    %75 = arith.addf %70, %74 : vector<16x32xf32>
    %76 = vector.extract_strided_slice %66 {offsets = [32, 0], sizes = [16, 32], strides = [1, 1]} : vector<64x32xf32> to vector<16x32xf32>
    %77 = vector.extract_strided_slice %8 {offsets = [32, 0], sizes = [1, 32], strides = [1, 1]} : vector<64x32xf32> to vector<1x32xf32>
    %78 = vector.broadcast %77 : vector<1x32xf32> to vector<16x32xf32>
    %79 = arith.mulf %76, %78 : vector<16x32xf32>
    %80 = arith.addf %75, %79 : vector<16x32xf32>
    %81 = vector.extract_strided_slice %66 {offsets = [48, 0], sizes = [16, 32], strides = [1, 1]} : vector<64x32xf32> to vector<16x32xf32>
    %82 = vector.extract_strided_slice %8 {offsets = [48, 0], sizes = [1, 32], strides = [1, 1]} : vector<64x32xf32> to vector<1x32xf32>
    %83 = vector.broadcast %82 : vector<1x32xf32> to vector<16x32xf32>
    %84 = arith.mulf %81, %83 : vector<16x32xf32>
    %85 = arith.addf %80, %84 : vector<16x32xf32>
    %cst_31 = arith.constant dense<0.000000e+00> : vector<16x32xf32>
    %86 = tpu.matmul %85, %5, %cst_31 {dimension_numbers = #tpu.dot_dimension_numbers<[1], [0], [0], [1], [0, 0, 1, 1], [], []>} : vector<16x32xf32>, vector<32x32xf32>, vector<16x32xf32> -> vector<16x32xf32>
    %87 = vector.broadcast %17 : vector<1x32xf32> to vector<16x32xf32>
    %88 = arith.addf %86, %87 : vector<16x32xf32>
    %89 = arith.addf %0, %88 : vector<16x32xf32>
    %cst_32 = arith.constant dense<0.000000e+00> : vector<16xf32>
    %90 = vector.multi_reduction <add>, %89, %cst_32 [1] : vector<16x32xf32> to vector<16xf32>
    %91 = vector.shape_cast %90 : vector<16xf32> to vector<16x1xf32>
    %cst_33 = arith.constant 3.200000e+01 : f32
    %92 = vector.broadcast %cst_33 : f32 to vector<16x1xf32>
    %93 = arith.divf %91, %92 : vector<16x1xf32>
    %94 = vector.broadcast %93 : vector<16x1xf32> to vector<16x32xf32>
    %95 = arith.subf %89, %94 : vector<16x32xf32>
    %96 = arith.mulf %95, %95 : vector<16x32xf32>
    %cst_34 = arith.constant dense<0.000000e+00> : vector<16xf32>
    %97 = vector.multi_reduction <add>, %96, %cst_34 [1] : vector<16x32xf32> to vector<16xf32>
    %98 = vector.shape_cast %97 : vector<16xf32> to vector<16x1xf32>
    %cst_35 = arith.constant 3.100000e+01 : f32
    %99 = vector.broadcast %cst_35 : f32 to vector<16x1xf32>
    %100 = arith.divf %98, %99 : vector<16x1xf32>
    %101 = vector.broadcast %93 : vector<16x1xf32> to vector<16x32xf32>
    %102 = arith.subf %89, %101 : vector<16x32xf32>
    %103 = vector.broadcast %14 : vector<1x32xf32> to vector<16x32xf32>
    %104 = arith.mulf %103, %102 : vector<16x32xf32>
    %105 = math.sqrt %100 : vector<16x1xf32>
    %cst_36 = arith.constant 9.99999997E-7 : f32
    %106 = vector.broadcast %cst_36 : f32 to vector<16x1xf32>
    %107 = arith.addf %105, %106 : vector<16x1xf32>
    %108 = vector.broadcast %107 : vector<16x1xf32> to vector<16x32xf32>
    %109 = arith.divf %104, %108 : vector<16x32xf32>
    %110 = vector.broadcast %15 : vector<1x32xf32> to vector<16x32xf32>
    %111 = arith.addf %109, %110 : vector<16x32xf32>
    %cst_37 = arith.constant dense<0.000000e+00> : vector<16x64xf32>
    %112 = tpu.matmul %111, %6, %cst_37 {dimension_numbers = #tpu.dot_dimension_numbers<[1], [0], [0], [1], [0, 0, 1, 1], [], []>} : vector<16x32xf32>, vector<32x64xf32>, vector<16x64xf32> -> vector<16x64xf32>
    %113 = vector.broadcast %18 : vector<1x64xf32> to vector<16x64xf32>
    %114 = arith.addf %112, %113 : vector<16x64xf32>
    %cst_38 = arith.constant 0.000000e+00 : f32
    %115 = vector.broadcast %cst_38 : f32 to vector<16x64xf32>
    %116 = arith.maximumf %114, %115 : vector<16x64xf32>
    %cst_39 = arith.constant dense<0.000000e+00> : vector<16x32xf32>
    %117 = tpu.matmul %116, %7, %cst_39 {dimension_numbers = #tpu.dot_dimension_numbers<[1], [0], [0], [1], [0, 0, 1, 1], [], []>} : vector<16x64xf32>, vector<64x32xf32>, vector<16x32xf32> -> vector<16x32xf32>
    %118 = vector.broadcast %19 : vector<1x32xf32> to vector<16x32xf32>
    %119 = arith.addf %117, %118 : vector<16x32xf32>
    %120 = arith.addf %89, %119 : vector<16x32xf32>
    %c0_40 = arith.constant 0 : index
    %c0_41 = arith.constant 0 : index
    %121 = vector.load %arg3[%c0_40, %c0_41] : memref<16x32xf32, #tpu.memory_space<vmem>>, vector<16x32xf32>
    tpu.vector_store %arg3[%c0_40, %c0_41], %120 {strides = array<i32>} : memref<16x32xf32, #tpu.memory_space<vmem>>, vector<16x32xf32>,
    return
  }
}

</mosaic_0001>

<bundles_post_ra>
// kernel: tpu_custom_call.1
= control target key start
LH: loop header
LB: loop body
LE: loop exit
PB: predicated region body
PF: predicated region fallthrough
CT: control target
= control target key end

     0   :  { %8 = vsyncpa [#allocation3], 0  ;;  %s1487_s0 = inlined_call_operand.hbm [shape: f32[16,32], index: 0, kind: input, shape index: {}]   ;;  %s1488_s1 = inlined_call_operand.vmem [shape: f32[1,16], index: 1, kind: input, shape index: {}]   ;;  %s1489_s2 = inlined_call_operand.hbm [shape: f32[296,128], index: 2, kind: input, shape index: {}]   ;;  %s1490_s3 = inlined_call_operand.hbm [shape: f32[16,32], index: 3, kind: output, shape index: {}]  }
   0x1   :  { %9 = vsyncpa [#allocation6], 0 }
   0x2   :  { %10 = vsyncpa [#allocation4], 0  ;;  %s1296_s12 = smov [#allocation2]  }
   0x3   :  { %s16_s13 = sshll.u32 %s1296_s12, 4  ;;  %s17_s13 = int_to_ptr.vmem [resolvable:$true] %s16_s13 }
   0x4   :  { %s1238_s14 = scalar_lea.vmem %s17_s13, 256  ;;  %p1243_p1 = scmp.lt.s32.totalorder %s17_s13, %s17_s13 }
   0x5   :  { %p1239_p0 = scmp.ne.s32.totalorder %s17_s13, %s1238_s14  ;;  %p1244_p2 = scmp.lt.s32.totalorder %s1238_s14, %s1238_s14 }
   0x7   :  { %p1245_p3 = por %p1244_p2, %p1243_p1 }
   0x9   :  { %p1246_p4 = pnand %p1245_p3, %p1239_p0 }
   0xb   :  { %1249 = shalt.err (!%p1246_p4)
}
   0xc   :  { %s1297_s15 = smov 128   ;;  %s1298_s16 = smov 8  }
   0xd   :  { %22 = dma.hbm_to_vmem [thread:$0]  %s1487_s0, 256, %s17_s13, [#allocation3], %s1297_s15, %s1297_s15, %s1298_s16  }
   0xe   :  { %s1299_s19 = smov [#allocation5]  }
   0xf   :  { %s30_s20 = sshll.u32 %s1299_s19, 4  ;;  %s31_s20 = int_to_ptr.vmem [resolvable:$true] %s30_s20 }
  0x10   :  { %s1258_s21 = scalar_lea.vmem %s31_s20, 4736  ;;  %p1263_p6 = scmp.lt.s32.totalorder %s31_s20, %s31_s20 }
  0x11   :  { %p1259_p5 = scmp.ne.s32.totalorder %s31_s20, %s1258_s21  ;;  %p1264_p7 = scmp.lt.s32.totalorder %s1258_s21, %s1258_s21 }
  0x13   :  { %p1265_p8 = por %p1264_p7, %p1263_p6 }
  0x15   :  { %p1266_p9 = pnand %p1265_p8, %p1259_p5 }
  0x17   :  { %1269 = shalt.err (!%p1266_p9)
}
  0x18   :  { %36 = dma.hbm_to_vmem [thread:$0]  %s1489_s2, 4736, %s31_s20, [#allocation6], %s1297_s15, %s1297_s15, %s1298_s16  }
  0x19   :  { %1290 = dma.done.wait [#allocation3], 256  }
  0x1a   :  { %1291 = vsyncadd [#allocation3], 4294967040 }
  0x1b   :  { %1292 = dma.done.wait [#allocation6], 4736  }
  0x1c   :  { %1293 = vsyncadd [#allocation6], 4294962560  ;;  %vm99_vm0 = vcmask 261120   ;;  %v1336_v0 = vld [vmem:[#allocation2] sm:$0xff]  ;;  %v1338_v1 = vld [vmem:[#allocation2 + $0x8] sm:$0xff]  ;;  %s1300_s0 = smov 96  }
  0x1d   :  { %v100_v2 = vsel %vm99_vm0, %v1336_v0, 0.0  ;;  %v103_v3 = vsel %vm99_vm0, %v1338_v1, 0.0  ;;  %v50_v14 = vld [vmem:[#allocation5 + $0x18] sm:$0xff]  ;;  %v49_v15 = vld [vmem:[#allocation5 + $0x10] sm:$0xff]  ;;  %v48_v16 = vld [vmem:[#allocation5 + $0x8] sm:$0xff]  ;;  %vm416_vm11 = vcmask 130048  }
  0x1e   :  { %101 = vadd.xlane.f32.xlu0 %v100_v2  ;;  %1086 = vmatprep.subr.mxu0 %v50_v14  ;;  %v47_v17 = vld [vmem:[#allocation5] sm:$0xff]  ;;  %v1354_v49 = vld [vmem:[#allocation5 + $0xb0] sm:$0xff]  ;;  %v68_v55 = vld [vmem:[#allocation5 + $0xa8] sm:$0xff]  ;;  %s1303_s25 = smov [#allocation7]  }
  0x1f   :  { %1087 = vmatpush3.msra.mxu0 %v50_v14  ;;  %v1004_v34 = vld [vmem:[#allocation5 + $0x120] ss:$0 sm:$0xff]  ;;  %v1005_v37 = vld [vmem:[#allocation5 + $0x121] ss:$0 sm:$0xff]  ;;  %v1006_v44 = vld [vmem:[#allocation5 + $0x124] ss:$0 sm:$0xff] }
  0x20   :  { %1088 = vmatprep.subr.mxu0 %v49_v15  ;;  %v1352_v48 = vld [vmem:[#allocation5 + $0xa0] sm:$0xff]  ;;  %v70_v56 = vld [vmem:[#allocation5 + $0xb8] sm:$0xff]  ;;  %v72_v61 = vld [vmem:[#allocation5 + $0xc8] sm:$0xff]  ;;  %s991_s26 = sshll.u32 %s1303_s25, 4  ;;  %s992_s26 = int_to_ptr.vmem [resolvable:$true] %s991_s26 }
  0x21   :  { %1089 = vmatpush3.msra.mxu0 %v49_v15  ;;  %v1372_v57 = vld [vmem:[#allocation5 + $0xc0] sm:$0xff]  ;;  %v1382_v62 = vld [vmem:[#allocation5 + $0xd0] sm:$0xff]  ;;  %s1270_s27 = scalar_lea.vmem %s992_s26, 256  ;;  %p1275_p11 = scmp.lt.s32.totalorder %s992_s26, %s992_s26 }
  0x22   :  { %104 = vadd.xlane.f32.xlu0 %v103_v3  ;;  %1090 = vmatprep.subr.mxu0 %v48_v16  ;;  %v74_v3 = vld [vmem:[#allocation5 + $0xd8] sm:$0xff]  ;;  %v77_v14 = vld [vmem:[#allocation5 + $0xf0] sm:$0xff]  ;;  %p1271_p10 = scmp.ne.s32.totalorder %s992_s26, %s1270_s27  ;;  %p1276_p12 = scmp.lt.s32.totalorder %s1270_s27, %s1270_s27 }
  0x23   :  { %1091 = vmatpush3.msra.mxu0 %v48_v16  ;;  %v78_v16 = vld [vmem:[#allocation5 + $0xf8] sm:$0xff]  ;;  %vm85_vm9 = vcmp.gt.f32.partialorder %v77_v14, 0.0 }
  0x24   :  { %1092 = vmatprep.subr.mxu0 %v47_v17  ;;  %vm86_vm13 = vcmp.gt.f32.partialorder %v78_v16, 0.0  ;;  %p1277_p13 = por %p1276_p12, %p1275_p11 }
  0x25   :  { %1093 = vmatpush3.msra.mxu0 %v47_v17  ;;  %v79_v17 = vld [vmem:[#allocation5 + $0x100] sm:$0xff] }
  0x26   :  { %vm87_vm15 = vcmp.gt.f32.partialorder %v79_v17, 0.0  ;;  %p1278_p0 = pnand %p1277_p13, %p1271_p10 }
  0xa7   :  { %v102_v4 = vpop.xlane.xlu0 %101 }
  0xa8   :  { %v107_v5 = vmul.f32 0.03125, %v102_v4 }
  0xaa   :  { %v109_v6 = vsub.f32 %v1336_v0, %v107_v5  ;;  %v395_v5 = vlaneseq }
  0xab   :  { %v105_v7 = vpop.xlane.xlu0 %104 }
  0xac   :  { %v108_v8 = vmul.f32 0.03125, %v105_v7  ;;  %v111_v9 = vmul.f32 %v109_v6, %v109_v6  ;;  %v126_v35 = vmul.f32 %v1004_v34, %v109_v6  ;;  %v45_v6 = vld [vmem:[%s1488_s1] sm:$0x1]  ;;  %v396_v7 = vshrl.u32 %v395_v5, 7  ;;  %s1302_s1 = smov 64  }
  0xad   :  { %vm46_vm5 = vcmp.gt.f32.partialorder %v45_v6, 0.0 }
  0xae   :  { %v110_v10 = vsub.f32 %v1338_v1, %v108_v8  ;;  %v113_v11 = vsel %vm99_vm0, %v111_v9, 0.0  ;;  %v1395_v8 = vsub.s32 0, %v396_v7  ;;  %v1301_v9 = vmov 0  }
  0xaf   :  { %114 = vadd.xlane.f32.xlu1 %v113_v11 }
  0xb0   :  { %v112_v12 = vmul.f32 %v110_v10, %v110_v10  ;;  %v127_v39 = vmul.f32 %v1004_v34, %v110_v10  ;;  %v394_v10 = vsel %vm46_vm5, 1, %v1301_v9 }
  0xb1   :  { %v398_v11 = vrot.slane %v394_v10, %v1395_v8 }
  0xb2   :  { %v116_v13 = vsel %vm99_vm0, %v112_v12, 0.0  ;;  %v76_v12 = vld [vmem:[#allocation5 + $0xe8] sm:$0xff] }
  0xb3   :  { %117 = vadd.xlane.f32.xlu1 %v116_v13  ;;  %v75_v13 = vld [vmem:[#allocation5 + $0xe0] sm:$0xff]  ;;  %vm84_vm6 = vcmp.gt.f32.partialorder %v76_v12, 0.0  ;;  %vm1398_vm7 = vcmp.eq.s32.totalorder %v398_v11, 1 }
  0xb4   :  { %vm83_vm8 = vcmp.gt.f32.partialorder %v75_v13, 0.0  ;;  %vm401_vm10 = vmand %vm84_vm6, %vm1398_vm7 }
  0xb5   :  { %vm1406_vm12 = vmand %vm83_vm8, %vm1398_vm7 }
  0xb6   :  { %vm402_vm14 = vmand %vm85_vm9, %vm1398_vm7 }
 0x138   :  { %v115_v18 = vpop.xlane.xlu1 %114 }
 0x139   :  { %v120_v19 = vmul.f32 0.032258064, %v115_v18 }
 0x13b   :  { %1182 = vrsqrt.f32 %v120_v19  ;;  %vm130_vm1 = vcmp.eq.f32.partialorder %v120_v19, inf  ;;  %v133_v24 = vand.u32 2147483648, %v120_v19  ;;  %vm132_vm2 = vcmp.eq.f32.partialorder %v120_v19, 0.0 }
 0x13c   :  { %v118_v20 = vpop.xlane.xlu1 %117 }
 0x13d   :  { %v121_v21 = vmul.f32 0.032258064, %v118_v20 }
 0x13f   :  { %1184 = vrsqrt.f32 %v121_v21  ;;  %vm137_vm3 = vcmp.eq.f32.partialorder %v121_v21, inf  ;;  %v140_v30 = vand.u32 2147483648, %v121_v21  ;;  %vm139_vm4 = vcmp.eq.f32.partialorder %v121_v21, 0.0 }
 0x148   :  { %v1183_v22 = vpop.eup %1182 }
 0x149   :  { %v129_v23 = vmul.f32 %v1183_v22, %v120_v19 }
 0x14b   :  { %v131_v25 = vsel %vm130_vm1, %v120_v19, %v129_v23  ;;  %vm403_vm1 = vmand %vm86_vm13, %vm1398_vm7  ;;  %vm900_vm13 = vcmask 523264  }
 0x14c   :  { %v1185_v26 = vpop.eup %1184  ;;  %v134_v27 = vsel %vm132_vm2, %v133_v24, %v131_v25  ;;  %v80_v25 = vld [vmem:[#allocation5 + $0x108] sm:$0xff] }
 0x14d   :  { %v136_v28 = vmul.f32 %v1185_v26, %v121_v21  ;;  %v142_v29 = vadd.f32 1e-06, %v134_v27  ;;  %v81_v26 = vld [vmem:[#allocation5 + $0x110] sm:$0xff]  ;;  %vm88_vm2 = vcmp.gt.f32.partialorder %v80_v25, 0.0 }
 0x14e   :  { %vm405_vm5 = vmand %vm88_vm2, %vm1398_vm7 }
 0x14f   :  { %v138_v31 = vsel %vm137_vm3, %v121_v21, %v136_v28  ;;  %1186 = vrcp.f32 %v142_v29  ;;  %vm404_vm3 = vmand %vm87_vm15, %vm1398_vm7 }
 0x150   :  { %v141_v32 = vsel %vm139_vm4, %v140_v30, %v138_v31  ;;  %vm89_vm4 = vcmp.gt.f32.partialorder %v81_v26, 0.0 }
 0x151   :  { %v143_v33 = vadd.f32 1e-06, %v141_v32  ;;  %vm406_vm8 = vmand %vm89_vm4, %vm1398_vm7 }
 0x153   :  { %1188 = vrcp.f32 %v143_v33 }
 0x15c   :  { %v1187_v36 = vpop.eup %1186 }
 0x15d   :  { %v145_v38 = vmul.f32 %v1187_v36, %v126_v35  ;;  %v82_v36 = vld [vmem:[#allocation5 + $0x118] sm:$0xff] }
 0x15e   :  { %vm90_vm6 = vcmp.gt.f32.partialorder %v82_v36, 0.0 }
 0x15f   :  { %v152_v40 = vadd.f32 %v1005_v37, %v145_v38  ;;  %vm407_vm9 = vmand %vm90_vm6, %vm1398_vm7 }
 0x160   :  { %v1189_v41 = vpop.eup %1188 }
 0x161   :  { %v147_v42 = vmul.f32 %v1189_v41, %v127_v39  ;;  %1094 = vmatprep.mubr.msk.f32.mxu0 %vm99_vm0, %v152_v40 }
 0x163   :  { %v153_v43 = vadd.f32 %v1005_v37, %v147_v42 }
 0x165   :  { %1095 = vmatmul.mubr.msk.f32.vlgmr.msra.gmra.mxu0 %vm99_vm0, %v153_v43 }
 0x225   :  { %v1096_v45 = vpop.f32.mrf.mxu0 }
 0x226   :  { %v1350_v46 = vadd.f32 %v1096_v45, %v1006_v44 }
 0x227   :  { %v230_v47 = vpop.f32.mrf.mxu0 }
 0x228   :  { %v1356_v50 = vadd.f32 %v1006_v44, %v230_v47  ;;  %251 = vrot.lane.b32.xlu0 %v1350_v46, %s1300_s0  ;;  %v240_v58 = vmul.f32 %v1350_v46, %v68_v55  ;;  %v242_v59 = vmul.f32 %v1350_v46, %v70_v56  ;;  %v244_v63 = vmul.f32 %v1350_v46, %v72_v61 }
 0x229   :  { %v246_v4 = vmul.f32 %v1350_v46, %v74_v3 }
 0x22a   :  { %249 = vrot.lane.b32.xlu1 %v1356_v50, %s1300_s0  ;;  %v239_v51 = vmul.f32 %v1356_v50, %v1352_v48  ;;  %v241_v52 = vmul.f32 %v1356_v50, %v1354_v49  ;;  %v243_v60 = vmul.f32 %v1356_v50, %v1372_v57  ;;  %v245_v2 = vmul.f32 %v1356_v50, %v1382_v62 }
 0x22c   :  { %1101 = vmatprep.mubr.msk.f32.mxu0 %vm99_vm0, %v239_v51  ;;  %1104 = vmatprep.mubr.msk.f32.mxu1 %vm99_vm0, %v241_v52 }
 0x29a   :  { %v252_v53 = vpop.permute.xlu0 %251 }
 0x29b   :  { %1097 = vmatprep.subr.msk.mxu0 %vm99_vm0, %v252_v53  ;;  %1170 = vmatprep.subr.msk.mxu1 %vm99_vm0, %v252_v53 }
 0x29c   :  { %1098 = vmatpush3.xpose.msk.msra.mxu0 %vm99_vm0, %v252_v53  ;;  %1172 = vmatpush3.xpose.msk.msra.mxu1 %vm99_vm0, %v252_v53  ;;  %v250_v54 = vpop.permute.xlu1 %249 }
 0x29d   :  { %1099 = vmatprep.subr.msk.mxu0 %vm99_vm0, %v250_v54  ;;  %1171 = vmatprep.subr.msk.mxu1 %vm99_vm0, %v250_v54 }
 0x2a0   :  { %1100 = vmatpush3.xpose.msk.msra.mxu0 %vm99_vm0, %v250_v54  ;;  %1173 = vmatpush3.xpose.msk.msra.mxu1 %vm99_vm0, %v250_v54 }
 0x2a3   :  { %1102 = vmatmul.mubr.msk.f32.vlgmr.msra.gmra.mxu0 %vm99_vm0, %v240_v58  ;;  %1105 = vmatmul.mubr.msk.f32.vlgmr.msra.gmra.mxu1 %vm99_vm0, %v242_v59 }
 0x2a4   :  { %1107 = vmatprep.mubr.msk.f32.mxu1 %vm99_vm0, %v243_v60 }
 0x2a7   :  { %1108 = vmatmul.mubr.msk.f32.gmra.mxu1 %vm99_vm0, %v244_v63 }
 0x2a8   :  { %1110 = vmatprep.mubr.msk.f32.mxu1 %vm99_vm0, %v245_v2 }
 0x2ab   :  { %1111 = vmatmul.mubr.msk.f32.gmra.mxu1 %vm99_vm0, %v246_v4 }
 0x363   :  { %v1103_v18 = vpop.f32.mrf.mxu0  ;;  %v1106_v19 = vpop.f32.mrf.mxu1 }
 0x364   :  { %v387_v20 = vmul.f32 0.35355338, %v1103_v18  ;;  %v389_v22 = vmul.f32 0.35355338, %v1106_v19 }
 0x365   :  { %v347_v23 = vpop.f32.mrf.mxu0  ;;  %v357_v24 = vpop.f32.mrf.mxu1 }
 0x366   :  { %v386_v27 = vmul.f32 0.35355338, %v347_v23  ;;  %v388_v28 = vmul.f32 0.35355338, %v357_v24  ;;  %v409_v29 = vsel %vm401_vm10, %v387_v20, -1e+09 }
 0x367   :  { %v1109_v30 = vpop.f32.mrf.mxu1  ;;  %v420_v31 = vsel %vm416_vm11, %v409_v29, -inf  ;;  %v411_v39 = vsel %vm403_vm1, %v389_v22, -1e+09 }
 0x368   :  { %421 = vmax.xlane.f32.xlu0 %v420_v31  ;;  %v408_v32 = vsel %vm1406_vm12, %v386_v27, -1e+09  ;;  %v410_v33 = vsel %vm402_vm14, %v388_v28, -1e+09  ;;  %v391_v37 = vmul.f32 0.35355338, %v1109_v30 }
 0x369   :  { %v367_v34 = vpop.f32.mrf.mxu1  ;;  %v417_v35 = vsel %vm416_vm11, %v408_v32, -inf  ;;  %v423_v41 = vsel %vm416_vm11, %v410_v33, -inf  ;;  %v426_v44 = vsel %vm416_vm11, %v411_v39, -inf }
 0x36a   :  { %v390_v38 = vmul.f32 0.35355338, %v367_v34  ;;  %418 = vmax.xlane.f32.xlu1 %v417_v35  ;;  %v413_v51 = vsel %vm405_vm5, %v391_v37, -1e+09 }
 0x36b   :  { %v1112_v40 = vpop.f32.mrf.mxu1  ;;  %v432_v54 = vsel %vm416_vm11, %v413_v51, -inf }
 0x36c   :  { %424 = vmax.xlane.f32.xlu0 %v423_v41  ;;  %v412_v42 = vsel %vm404_vm3, %v390_v38, -1e+09  ;;  %v393_v45 = vmul.f32 0.35355338, %v1112_v40 }
 0x36d   :  { %v377_v43 = vpop.f32.mrf.mxu1  ;;  %v429_v52 = vsel %vm416_vm11, %v412_v42, -inf }
 0x36e   :  { %v392_v47 = vmul.f32 0.35355338, %v377_v43  ;;  %427 = vmax.xlane.f32.xlu1 %v426_v44  ;;  %v415_v55 = vsel %vm407_vm9, %v393_v45, -1e+09 }
 0x36f   :  { %v438_v58 = vsel %vm416_vm11, %v415_v55, -inf }
 0x370   :  { %430 = vmax.xlane.f32.xlu0 %v429_v52  ;;  %v414_v53 = vsel %vm406_vm8, %v392_v47, -1e+09 }
 0x371   :  { %v435_v56 = vsel %vm416_vm11, %v414_v53, -inf }
 0x372   :  { %433 = vmax.xlane.f32.xlu1 %v432_v54 }
 0x374   :  { %436 = vmax.xlane.f32.xlu0 %v435_v56 }
 0x376   :  { %439 = vmax.xlane.f32.xlu1 %v438_v58 }
 0x3f1   :  { %v422_v59 = vpop.xlane.xlu0 %421 }
 0x3f2   :  { %v442_v60 = vsub.f32 %v409_v29, %v422_v59 }
 0x3f3   :  { %v419_v61 = vpop.xlane.xlu1 %418 }
 0x3f4   :  { %v451_v63 = vmul.f32 1.442695, %v442_v60  ;;  %v441_v2 = vsub.f32 %v408_v32, %v419_v61 }
 0x3f5   :  { %v425_v3 = vpop.xlane.xlu0 %424 }
 0x3f6   :  { %1190 = vpow2.f32 %v451_v63  ;;  %v449_v4 = vmul.f32 1.442695, %v441_v2  ;;  %v443_v5 = vsub.f32 %v410_v33, %v425_v3 }
 0x3f7   :  { %v428_v6 = vpop.xlane.xlu1 %427 }
 0x3f8   :  { %1192 = vpow2.f32 %v449_v4  ;;  %v453_v7 = vmul.f32 1.442695, %v443_v5  ;;  %v444_v9 = vsub.f32 %v411_v39, %v428_v6 }
 0x3f9   :  { %v431_v10 = vpop.xlane.xlu0 %430 }
 0x3fa   :  { %1194 = vpow2.f32 %v453_v7  ;;  %v455_v11 = vmul.f32 1.442695, %v444_v9  ;;  %v445_v12 = vsub.f32 %v412_v42, %v431_v10  ;;  %v54_v7 = vld [vmem:[#allocation5 + $0x38] sm:$0xff]  ;;  %v53_v9 = vld [vmem:[#allocation5 + $0x30] sm:$0xff]  ;;  %v52_v10 = vld [vmem:[#allocation5 + $0x28] sm:$0xff] }
 0x3fb   :  { %v434_v13 = vpop.xlane.xlu1 %433  ;;  %1129 = vmatprep.subr.mxu1 %v54_v7 }
 0x3fc   :  { %1196 = vpow2.f32 %v455_v11  ;;  %v457_v14 = vmul.f32 1.442695, %v445_v12  ;;  %v446_v15 = vsub.f32 %v413_v51, %v434_v13  ;;  %1130 = vmatpush3.msra.mxu1 %v54_v7  ;;  %v51_v11 = vld [vmem:[#allocation5 + $0x20] sm:$0xff] }
 0x3fd   :  { %v437_v16 = vpop.xlane.xlu0 %436  ;;  %1131 = vmatprep.subr.mxu1 %v53_v9 }
 0x3fe   :  { %1198 = vpow2.f32 %v457_v14  ;;  %v459_v17 = vmul.f32 1.442695, %v446_v15  ;;  %v447_v18 = vsub.f32 %v414_v53, %v437_v16  ;;  %1132 = vmatpush3.msra.mxu1 %v53_v9  ;;  %v649_v15 = vrot.slane %v1354_v49, %v1395_v8 }
 0x3ff   :  { %v440_v19 = vpop.xlane.xlu1 %439  ;;  %1133 = vmatprep.subr.mxu1 %v52_v10 }
 0x400   :  { %1200 = vpow2.f32 %v459_v17  ;;  %v461_v20 = vmul.f32 1.442695, %v447_v18  ;;  %v448_v21 = vsub.f32 %v415_v55, %v440_v19  ;;  %1134 = vmatpush3.msra.mxu1 %v52_v10  ;;  %v643_v17 = vrot.slane %v1352_v48, %v1395_v8 }
 0x401   :  { %1135 = vmatprep.subr.mxu1 %v51_v11  ;;  %v657_v19 = vrot.slane %v1372_v57, %v1395_v8 }
 0x402   :  { %1202 = vpow2.f32 %v461_v20  ;;  %v463_v22 = vmul.f32 1.442695, %v448_v21  ;;  %1136 = vmatpush3.msra.mxu1 %v51_v11 }
 0x403   :  { %v1191_v23 = vpop.eup %1190 }
 0x404   :  { %1204 = vpow2.f32 %v463_v22  ;;  %v468_v24 = vsel %vm416_vm11, %v1191_v23, 0.0 }
 0x405   :  { %v1193_v25 = vpop.eup %1192  ;;  %469 = vadd.xlane.f32.xlu1 %v468_v24 }
 0x406   :  { %v465_v26 = vsel %vm416_vm11, %v1193_v25, 0.0 }
 0x407   :  { %v1195_v27 = vpop.eup %1194  ;;  %466 = vadd.xlane.f32.xlu0 %v465_v26 }
 0x408   :  { %v471_v29 = vsel %vm416_vm11, %v1195_v27, 0.0 }
 0x409   :  { %v1197_v28 = vpop.eup %1196 }
 0x40a   :  { %v474_v30 = vsel %vm416_vm11, %v1197_v28, 0.0 }
 0x40b   :  { %v1199_v31 = vpop.eup %1198  ;;  %472 = vadd.xlane.f32.xlu0 %v471_v29  ;;  %475 = vadd.xlane.f32.xlu1 %v474_v30 }
 0x40c   :  { %v477_v33 = vsel %vm416_vm11, %v1199_v31, 0.0 }
 0x40d   :  { %v1201_v32 = vpop.eup %1200 }
 0x40e   :  { %v480_v34 = vsel %vm416_vm11, %v1201_v32, 0.0 }
 0x40f   :  { %v1203_v35 = vpop.eup %1202  ;;  %478 = vadd.xlane.f32.xlu0 %v477_v33  ;;  %481 = vadd.xlane.f32.xlu1 %v480_v34 }
 0x410   :  { %v483_v37 = vsel %vm416_vm11, %v1203_v35, 0.0 }
 0x411   :  { %v1205_v36 = vpop.eup %1204 }
 0x412   :  { %v486_v38 = vsel %vm416_vm11, %v1205_v36, 0.0 }
 0x413   :  { %484 = vadd.xlane.f32.xlu0 %v483_v37  ;;  %487 = vadd.xlane.f32.xlu1 %v486_v38 }
 0x424   :  { %505 = vrot.lane.b32.xlu1 %v1356_v50, %s1302_s1 }
 0x429   :  { %507 = vrot.lane.b32.xlu0 %v1350_v46, %s1302_s1 }
 0x48e   :  { %v470_v39 = vpop.xlane.xlu1 %469 }
 0x490   :  { %v467_v40 = vpop.xlane.xlu0 %466 }
 0x491   :  { %1206 = vrcp.f32 %v467_v40 }
 0x492   :  { %1208 = vrcp.f32 %v470_v39 }
 0x494   :  { %v473_v41 = vpop.xlane.xlu0 %472  ;;  %v476_v42 = vpop.xlane.xlu1 %475 }
 0x495   :  { %1210 = vrcp.f32 %v473_v41 }
 0x496   :  { %1212 = vrcp.f32 %v476_v42 }
 0x498   :  { %v479_v43 = vpop.xlane.xlu0 %478  ;;  %v482_v44 = vpop.xlane.xlu1 %481 }
 0x499   :  { %1214 = vrcp.f32 %v479_v43 }
 0x49a   :  { %1216 = vrcp.f32 %v482_v44 }
 0x49c   :  { %v485_v45 = vpop.xlane.xlu0 %484  ;;  %v488_v47 = vpop.xlane.xlu1 %487 }
 0x49d   :  { %1218 = vrcp.f32 %v485_v45 }
 0x49e   :  { %v1207_v51 = vpop.eup %1206  ;;  %1220 = vrcp.f32 %v488_v47 }
 0x49f   :  { %v490_v50 = vmul.f32 %v1207_v51, %v1193_v25  ;;  %v1209_v52 = vpop.eup %1208 }
 0x4a0   :  { %v508_v46 = vpop.permute.xlu0 %507  ;;  %v506_v54 = vpop.permute.xlu1 %505  ;;  %v492_v55 = vmul.f32 %v1209_v52, %v1191_v23  ;;  %v665_v23 = vrot.slane %v1382_v62, %v1395_v8 }
 0x4a1   :  { %1113 = vmatprep.subr.mxu0 %v508_v46  ;;  %1117 = vmatprep.mubr.msk.f32.mxu0 %vm416_vm11, %v490_v50 }
 0x4a2   :  { %v1211_v53 = vpop.eup %1210  ;;  %1114 = vmatpush3.msra.mxu0 %v508_v46  ;;  %v58_v46 = vld [vmem:[#allocation5 + $0x58] sm:$0xff] }
 0x4a3   :  { %1115 = vmatprep.subr.mxu0 %v506_v54  ;;  %v494_v56 = vmul.f32 %v1211_v53, %v1195_v27  ;;  %v1213_v58 = vpop.eup %1212  ;;  %v57_v53 = vld [vmem:[#allocation5 + $0x50] sm:$0xff] }
 0x4a4   :  { %1116 = vmatpush3.msra.mxu0 %v506_v54  ;;  %v496_v60 = vmul.f32 %v1213_v58, %v1197_v28  ;;  %v56_v54 = vld [vmem:[#allocation5 + $0x48] sm:$0xff]  ;;  %v65_v58 = vld [vmem:[#allocation5 + $0x90] sm:$0xff] }
 0x4a5   :  { %1118 = vmatmul.mubr.msk.f32.vlgmr.msra.gmra.mxu0 %vm416_vm11, %v492_v55  ;;  %1140 = vmatprep.subr.mxu0 %v58_v46  ;;  %v55_v55 = vld [vmem:[#allocation5 + $0x40] sm:$0xff] }
 0x4a6   :  { %v1215_v59 = vpop.eup %1214  ;;  %1120 = vmatprep.mubr.msk.f32.mxu0 %vm416_vm11, %v494_v56  ;;  %1141 = vmatpush3.msra.mxu0 %v58_v46  ;;  %v66_v56 = vld [vmem:[#allocation5 + $0x98] sm:$0xff] }
 0x4a7   :  { %v498_v61 = vmul.f32 %v1215_v59, %v1199_v31  ;;  %v1217_v63 = vpop.eup %1216  ;;  %1142 = vmatprep.subr.mxu0 %v57_v53  ;;  %1151 = vmatprep.subr.mxu1 %v66_v56  ;;  %v64_v59 = vld [vmem:[#allocation5 + $0x88] sm:$0xff] }
 0x4a8   :  { %v500_v3 = vmul.f32 %v1217_v63, %v1201_v32  ;;  %1143 = vmatpush3.msra.mxu0 %v57_v53 }
 0x4a9   :  { %1121 = vmatmul.mubr.msk.f32.gmra.mxu0 %vm416_vm11, %v496_v60  ;;  %1144 = vmatprep.subr.mxu0 %v56_v54  ;;  %v63_v60 = vld [vmem:[#allocation5 + $0x80] sm:$0xff] }
 0x4aa   :  { %v1219_v2 = vpop.eup %1218  ;;  %1123 = vmatprep.mubr.msk.f32.mxu0 %vm416_vm11, %v498_v61  ;;  %1145 = vmatpush3.msra.mxu0 %v56_v54 }
 0x4ab   :  { %v502_v4 = vmul.f32 %v1219_v2, %v1203_v35  ;;  %v1221_v5 = vpop.eup %1220  ;;  %v1027_v35 = vld [vmem:[#allocation5 + $0x125] ss:$0 sm:$0xff]  ;;  %1146 = vmatprep.subr.mxu0 %v55_v55 }
 0x4ac   :  { %v504_v6 = vmul.f32 %v1221_v5, %v1205_v36  ;;  %1147 = vmatpush3.msra.mxu0 %v55_v55 }
 0x4ad   :  { %1124 = vmatmul.mubr.msk.f32.gmra.mxu0 %vm416_vm11, %v500_v3 }
 0x4ae   :  { %1126 = vmatprep.mubr.msk.f32.mxu0 %vm416_vm11, %v502_v4 }
 0x4b1   :  { %1127 = vmatmul.mubr.msk.f32.gmra.mxu0 %vm416_vm11, %v504_v6 }
 0x565   :  { %v1119_v12 = vpop.f32.mrf.mxu0 }
 0x566   :  { %v645_v26 = vmul.f32 %v1119_v12, %v643_v17 }
 0x567   :  { %v601_v13 = vpop.f32.mrf.mxu0 }
 0x568   :  { %v644_v24 = vmul.f32 %v643_v17, %v601_v13  ;;  %v1030_v17 = vld [vmem:[#allocation5 + $0x122] ss:$0 sm:$0xff] }
 0x569   :  { %v1122_v14 = vpop.f32.mrf.mxu0 }
 0x56a   :  { %v651_v21 = vmul.f32 %v1122_v14, %v649_v15 }
 0x56b   :  { %v611_v16 = vpop.f32.mrf.mxu0 }
 0x56c   :  { %v650_v20 = vmul.f32 %v649_v15, %v611_v16  ;;  %v653_v29 = vadd.f32 %v651_v21, %v645_v26 }
 0x56d   :  { %v1125_v18 = vpop.f32.mrf.mxu0 }
 0x56e   :  { %v659_v27 = vmul.f32 %v1125_v18, %v657_v19  ;;  %v652_v49 = vadd.f32 %v650_v20, %v644_v24 }
 0x56f   :  { %v621_v22 = vpop.f32.mrf.mxu0 }
 0x570   :  { %v658_v25 = vmul.f32 %v657_v19, %v621_v22  ;;  %v661_v33 = vadd.f32 %v659_v27, %v653_v29  ;;  %v62_v27 = vld [vmem:[#allocation5 + $0x78] sm:$0xff]  ;;  %v59_v29 = vld [vmem:[#allocation5 + $0x60] sm:$0xff] }
 0x571   :  { %v1128_v28 = vpop.f32.mrf.mxu0 }
 0x572   :  { %v667_v30 = vmul.f32 %v1128_v28, %v665_v23  ;;  %v660_v48 = vadd.f32 %v658_v25, %v652_v49  ;;  %v61_v28 = vld [vmem:[#allocation5 + $0x70] sm:$0xff]  ;;  %v60_v49 = vld [vmem:[#allocation5 + $0x68] sm:$0xff] }
 0x573   :  { %v631_v31 = vpop.f32.mrf.mxu0 }
 0x574   :  { %v666_v32 = vmul.f32 %v665_v23, %v631_v31  ;;  %v669_v57 = vadd.f32 %v667_v30, %v661_v33  ;;  %v1031_v23 = vld [vmem:[#allocation5 + $0x123] ss:$0 sm:$0xff]  ;;  %v1032_v30 = vld [vmem:[#allocation5 + $0x126] ss:$0 sm:$0xff] }
 0x576   :  { %v668_v34 = vadd.f32 %v666_v32, %v660_v48 }
 0x578   :  { %1137 = vmatprep.mubr.msk.f32.mxu1 %vm99_vm0, %v668_v34 }
 0x579   :  { %1138 = vmatmul.mubr.msk.f32.vlgmr.msra.gmra.mxu1 %vm99_vm0, %v669_v57 }
 0x57a   :  { %1152 = vmatpush3.msra.mxu1 %v66_v56 }
 0x57b   :  { %1153 = vmatprep.subr.mxu1 %v65_v58 }
 0x57c   :  { %1154 = vmatpush3.msra.mxu1 %v65_v58 }
 0x57d   :  { %1155 = vmatprep.subr.mxu1 %v64_v59 }
 0x57e   :  { %1156 = vmatpush3.msra.mxu1 %v64_v59 }
 0x57f   :  { %1157 = vmatprep.subr.mxu1 %v63_v60 }
 0x580   :  { %1158 = vmatpush3.msra.mxu1 %v63_v60 }
 0x581   :  { %1159 = vmatprep.subr.mxu1 %v62_v27 }
 0x582   :  { %1160 = vmatpush3.msra.mxu1 %v62_v27 }
 0x583   :  { %1161 = vmatprep.subr.mxu1 %v61_v28 }
 0x584   :  { %1162 = vmatpush3.msra.mxu1 %v61_v28 }
 0x585   :  { %1163 = vmatprep.subr.mxu1 %v60_v49 }
 0x586   :  { %1164 = vmatpush3.msra.mxu1 %v60_v49 }
 0x587   :  { %1165 = vmatprep.subr.mxu1 %v59_v29 }
 0x588   :  { %1166 = vmatpush3.msra.mxu1 %v59_v29 }
 0x639   :  { %v1139_v62 = vpop.f32.mrf.mxu1 }
 0x63a   :  { %v752_v8 = vadd.f32 %v1139_v62, %v1027_v35 }
 0x63b   :  { %v746_v36 = vpop.f32.mrf.mxu1 }
 0x63c   :  { %v1462_v37 = vadd.f32 %v752_v8, %v1338_v1  ;;  %v747_v38 = vadd.f32 %v1027_v35, %v746_v36  ;;  %v1035_v35 = vld [vmem:[#allocation5 + $0x127] ss:$0 sm:$0xff] }
 0x63e   :  { %v1465_v39 = vadd.f32 %v747_v38, %v1336_v0  ;;  %v760_v40 = vsel %vm99_vm0, %v1462_v37, 0.0 }
 0x63f   :  { %761 = vadd.xlane.f32.xlu0 %v760_v40 }
 0x640   :  { %v757_v41 = vsel %vm99_vm0, %v1465_v39, 0.0 }
 0x641   :  { %758 = vadd.xlane.f32.xlu1 %v757_v41 }
 0x6c8   :  { %v762_v42 = vpop.xlane.xlu0 %761 }
 0x6c9   :  { %v764_v43 = vmul.f32 0.03125, %v762_v42 }
 0x6ca   :  { %v759_v44 = vpop.xlane.xlu1 %758 }
 0x6cb   :  { %v766_v45 = vsub.f32 %v1462_v37, %v764_v43  ;;  %v763_v47 = vmul.f32 0.03125, %v759_v44 }
 0x6cd   :  { %v765_v1 = vsub.f32 %v1465_v39, %v763_v47  ;;  %v768_v51 = vmul.f32 %v766_v45, %v766_v45  ;;  %v782_v19 = vmul.f32 %v1030_v17, %v766_v45 }
 0x6cf   :  { %v772_v0 = vsel %vm99_vm0, %v768_v51, 0.0  ;;  %v767_v50 = vmul.f32 %v765_v1, %v765_v1  ;;  %v781_v20 = vmul.f32 %v1030_v17, %v765_v1 }
 0x6d0   :  { %773 = vadd.xlane.f32.xlu1 %v772_v0 }
 0x6d1   :  { %v769_v52 = vsel %vm99_vm0, %v767_v50, 0.0 }
 0x6d2   :  { %770 = vadd.xlane.f32.xlu0 %v769_v52 }
 0x759   :  { %v774_v61 = vpop.xlane.xlu1 %773 }
 0x75a   :  { %v776_v63 = vmul.f32 0.032258064, %v774_v61 }
 0x75b   :  { %v771_v2 = vpop.xlane.xlu0 %770 }
 0x75c   :  { %1222 = vrsqrt.f32 %v776_v63  ;;  %v775_v3 = vmul.f32 0.032258064, %v771_v2  ;;  %vm792_vm7 = vcmp.eq.f32.partialorder %v776_v63, inf  ;;  %v795_v6 = vand.u32 2147483648, %v776_v63 }
 0x75d   :  { %vm794_vm10 = vcmp.eq.f32.partialorder %v776_v63, 0.0 }
 0x75e   :  { %1224 = vrsqrt.f32 %v775_v3  ;;  %vm785_vm11 = vcmp.eq.f32.partialorder %v775_v3, inf  ;;  %v788_v13 = vand.u32 2147483648, %v775_v3  ;;  %vm787_vm12 = vcmp.eq.f32.partialorder %v775_v3, 0.0 }
 0x769   :  { %v1223_v4 = vpop.eup %1222 }
 0x76a   :  { %v791_v5 = vmul.f32 %v1223_v4, %v776_v63 }
 0x76b   :  { %v1225_v7 = vpop.eup %1224 }
 0x76c   :  { %v793_v9 = vsel %vm792_vm7, %v776_v63, %v791_v5  ;;  %v784_v11 = vmul.f32 %v1225_v7, %v775_v3 }
 0x76d   :  { %v796_v10 = vsel %vm794_vm10, %v795_v6, %v793_v9 }
 0x76e   :  { %v798_v12 = vadd.f32 1e-06, %v796_v10  ;;  %v786_v14 = vsel %vm785_vm11, %v775_v3, %v784_v11 }
 0x76f   :  { %v789_v15 = vsel %vm787_vm12, %v788_v13, %v786_v14 }
 0x770   :  { %1226 = vrcp.f32 %v798_v12  ;;  %v797_v16 = vadd.f32 1e-06, %v789_v15 }
 0x772   :  { %1228 = vrcp.f32 %v797_v16 }
 0x77d   :  { %v1227_v18 = vpop.eup %1226 }
 0x77e   :  { %v802_v22 = vmul.f32 %v1227_v18, %v782_v19 }
 0x77f   :  { %v1229_v21 = vpop.eup %1228 }
 0x780   :  { %v800_v24 = vmul.f32 %v1229_v21, %v781_v20  ;;  %v808_v26 = vadd.f32 %v1031_v23, %v802_v22 }
 0x782   :  { %v807_v25 = vadd.f32 %v1031_v23, %v800_v24 }
 0x784   :  { %1148 = vmatprep.mubr.msk.f32.mxu0 %vm99_vm0, %v807_v25 }
 0x785   :  { %1149 = vmatmul.mubr.msk.f32.vlgmr.msra.gmra.mxu0 %vm99_vm0, %v808_v26 }
 0x845   :  { %v1150_v31 = vpop.f32.mrf.mxu0 }
 0x846   :  { %v891_v48 = vadd.f32 %v1150_v31, %v1032_v30 }
 0x847   :  { %v885_v32 = vpop.f32.mrf.mxu0 }
 0x848   :  { %v886_v33 = vadd.f32 %v1032_v30, %v885_v32  ;;  %v895_v57 = vmax.f32 %v891_v48, 0.0 }
 0x84a   :  { %v894_v34 = vmax.f32 %v886_v33, 0.0 }
 0x84c   :  { %1167 = vmatprep.mubr.msk.f32.mxu1 %vm900_vm13, %v894_v34 }
 0x84d   :  { %1168 = vmatmul.mubr.msk.f32.vlgmr.msra.gmra.mxu1 %vm900_vm13, %v895_v57 }
 0x90d   :  { %v1169_v62 = vpop.f32.mrf.mxu1 }
 0x90e   :  { %v979_v8 = vadd.f32 %v1169_v62, %v1035_v35 }
 0x90f   :  { %v973_v36 = vpop.f32.mrf.mxu1 }
 0x910   :  { %v983_v38 = vadd.f32 %v979_v8, %v1462_v37  ;;  %v974_v40 = vadd.f32 %v1035_v35, %v973_v36 }
 0x912   :  { %985 = vst.msk [vmem:[#allocation7 + $0x8] sm:$0xff] %vm99_vm0, %v983_v38  ;;  %v982_v41 = vadd.f32 %v974_v40, %v1465_v39 }
 0x914   :  { %984 = vst.msk [vmem:[#allocation7] sm:$0xff] %vm99_vm0, %v982_v41 }
 0x915   :  { %1281 = shalt.err (!%p1278_p0)
}
 0x916   :  { %997 = dma.vmem_to_hbm [thread:$0]  %s992_s26, 256, %s1490_s3, [#allocation4], %s1297_s15, %s1297_s15, %s1298_s16  }
 0x917   :  { %1294 = dma.done.wait [#allocation4], 256  }
 0x918   :  { %1295 = vsyncadd [#allocation4], 4294967040 }
 0x919   :  { %1001 = vsyncpa [#allocation3], 1 }
 0x91a   :  { %1002 = vsyncpa [#allocation6], 1 }
 0x91b   :  { %1003 = vsyncpa [#allocation4], 1 }

</bundles_post_ra>
